<compile_context>
chip_gen: v7x
topology: tpu7x:2x2x1
jax: 0.10.0
libtpu: 0.0.40
codegen_flags: <defaults>
</compile_context>

<pallas_src>
import functools

import jax
import jax.numpy as jnp
from jax import lax
from jax.experimental import pallas as pl
from jax.experimental.pallas import tpu as pltpu


# ----------------------------- kernels --------------------------------------


def project_kernel(x_ref, w_ref, asrc_ref, adst_ref, xp_ref, ssrcT_ref, sdst_ref):
    """xp = x @ W and per-head attention scores, for one row tile."""
    x = x_ref[...].astype(jnp.bfloat16)              # [T, F_in]
    w = w_ref[...].astype(jnp.bfloat16)              # [F_in, H*F]
    xp = jnp.dot(x, w, preferred_element_type=jnp.float32)     # [T, H*F] f32

    # Source scores, lane-dense per head: s_srcT[h, j] = a_src_h . xp_j
    ssrcT_ref[...] = lax.dot_general(
        asrc_ref[...], xp, (((1,), (1,)), ((), ())),
        preferred_element_type=jnp.float32)                     # [H, T]
    # Destination scores: s_dst[i, h] = a_dst_h . xp_i
    sdst_ref[...] = jnp.dot(xp, adst_ref[...],
                            preferred_element_type=jnp.float32)  # [T, H]
    xp_ref[...] = xp.astype(jnp.bfloat16)


def attend_kernel(sdst_ref, ssrcT_ref, adj_ref, xp3_ref, bias_ref, out_ref,
                  *, heads, f_out, negative_slope, apply_relu, apply_log_softmax):
    """Masked softmax over incoming edges + aggregation, for one dst-row tile."""
    adjm = adj_ref[...]                               # [T, N] bf16 mask
    edge = adjm > 0
    sdst = sdst_ref[...]                              # [T, H] f32
    ssrcT = ssrcT_ref[...]                            # [H, N] f32
    bias = bias_ref[...]                              # [1, H*F] f32
    neg_big = jnp.float32(-1e30)

    for h in range(heads):                            # static unrolled head loop
        # e[i, j] = a_dst.xp_i + a_src.xp_j  -- VPU broadcast add (no K=1 MXU outer product)
        e = sdst[:, h:h + 1] + ssrcT[h:h + 1, :]      # [T, N]
        e = jnp.where(e > 0, e, negative_slope * e)   # LeakyReLU(0.2)
        e = jnp.where(edge, e, neg_big)               # mask non-edges
        m = jnp.max(e, axis=1, keepdims=True)
        p = jnp.exp(e - m)                            # masked entries underflow to 0
        denom = jnp.sum(p, axis=1, keepdims=True)     # >= 1 (row max contributes exp(0)=1)
        alpha = p * pl.reciprocal(denom, approx=True)  # EUP reciprocal, frees VALU slots

        # Aggregate: alpha @ xp_h on the MXU (bf16 operands, f32 accumulation).
        agg = jnp.dot(alpha.astype(jnp.bfloat16), xp3_ref[h],
                      preferred_element_type=jnp.float32)        # [T, F]

        outh = agg + bias[:, h * f_out:(h + 1) * f_out]
        if apply_relu:
            outh = jnp.maximum(outh, 0.0)
        if apply_log_softmax:                         # only used with heads == 1
            mm = jnp.max(outh, axis=1, keepdims=True)
            z = outh - mm
            outh = z - jnp.log(jnp.sum(jnp.exp(z), axis=1, keepdims=True))

        if heads == 1:
            out_ref[...] = outh.astype(out_ref.dtype)
        else:
            # Direct slab store per head -- avoids the lane-axis concatenate/relayout.
            out_ref[:, h * f_out:(h + 1) * f_out] = outh.astype(out_ref.dtype)


# ----------------------------- wrappers --------------------------------------


def _pad_up(n, m):
    return ((n + m - 1) // m) * m


def _choose_tiling(n):
    n8 = _pad_up(n, 8)
    tile = n8 if n8 <= 256 else 256
    n_pad = _pad_up(n8, tile)
    return n_pad, tile


def _block_rows(a, heads, f_out):
    """[H, F] attention vectors -> [H, H*F] block-diagonal row layout."""
    eye = jnp.eye(heads, dtype=a.dtype)
    return (eye[:, :, None] * a[None, :, :]).reshape(heads, heads * f_out)


_COMPILER_PARAMS = pltpu.CompilerParams(
    dimension_semantics=("parallel",),
    vmem_limit_bytes=48 * 1024 * 1024,
)


def gat_conv(x, adj, w, a_src, a_dst, bias, *, heads, f_out, tile,
             apply_relu=False, apply_log_softmax=False):
    n_pad, f_in = x.shape
    hf = heads * f_out
    grid = n_pad // tile
    assert not (apply_log_softmax and heads != 1)

    asrc_rows = _block_rows(a_src, heads, f_out)           # [H, HF]
    adst_cols = _block_rows(a_dst, heads, f_out).T         # [HF, H]

    # ---- stage 1: projection + per-head attention scores (tiled over rows) ----
    xp, s_srcT, s_dst = pl.pallas_call(
        project_kernel,
        grid_spec=pltpu.PrefetchScalarGridSpec(
            num_scalar_prefetch=0,
            grid=(grid,),
            in_specs=[
                pl.BlockSpec((tile, f_in), lambda i: (i, 0)),
                pl.BlockSpec((f_in, hf), lambda i: (0, 0)),
                pl.BlockSpec((heads, hf), lambda i: (0, 0)),
                pl.BlockSpec((hf, heads), lambda i: (0, 0)),
            ],
            out_specs=[
                pl.BlockSpec((tile, hf), lambda i: (i, 0)),
                pl.BlockSpec((heads, tile), lambda i: (0, i)),
                pl.BlockSpec((tile, heads), lambda i: (i, 0)),
            ],
        ),
        out_shape=(
            jax.ShapeDtypeStruct((n_pad, hf), jnp.bfloat16),
            jax.ShapeDtypeStruct((heads, n_pad), jnp.float32),
            jax.ShapeDtypeStruct((n_pad, heads), jnp.float32),
        ),
        compiler_params=_COMPILER_PARAMS,
        cost_estimate=pl.CostEstimate(
            flops=int(2 * n_pad * f_in * hf + 4 * n_pad * hf * heads),
            transcendentals=0,
            bytes_accessed=int(n_pad * f_in * 4 + f_in * hf * 4 + n_pad * hf * 2),
        ),
    )(x, w, asrc_rows, adst_cols)

    # Wrapper-side relayout of xp to [H, N, F] so the attend kernel indexes heads along
    # the leading axis instead of slicing 8-lane sub-tiles of a [N, H*F] vreg.
    xp3 = xp.reshape(n_pad, heads, f_out).transpose(1, 0, 2)   # [H, N, F] bf16

    # ---- stage 2: masked softmax + aggregation (tiled over destination rows) ----
    kern = functools.partial(attend_kernel, heads=heads, f_out=f_out,
                             negative_slope=0.2, apply_relu=apply_relu,
                             apply_log_softmax=apply_log_softmax)
    cost = pl.CostEstimate(
        flops=int(heads * n_pad * n_pad * (2 * f_out + 8)),
        transcendentals=int(heads * n_pad * n_pad),
        bytes_accessed=int(n_pad * n_pad * 2 + heads * n_pad * f_out * 2 + n_pad * hf * 4),
    )
    out = pl.pallas_call(
        kern,
        grid_spec=pltpu.PrefetchScalarGridSpec(
            num_scalar_prefetch=0,
            grid=(grid,),
            in_specs=[
                pl.BlockSpec((tile, heads), lambda i: (i, 0)),            # s_dst
                pl.BlockSpec((heads, n_pad), lambda i: (0, 0)),           # s_srcT
                pl.BlockSpec((tile, n_pad), lambda i: (i, 0)),            # adj (bf16)
                pl.BlockSpec((heads, n_pad, f_out), lambda i: (0, 0, 0)),  # xp3 (bf16)
                pl.BlockSpec((1, hf), lambda i: (0, 0)),                  # bias
            ],
            out_specs=pl.BlockSpec((tile, hf), lambda i: (i, 0)),
        ),
        out_shape=jax.ShapeDtypeStruct((n_pad, hf), jnp.float32),
        compiler_params=_COMPILER_PARAMS,
        cost_estimate=cost,
    )(s_dst, s_srcT, adj, xp3, bias)
    return out


def gat_forward(x, adj, params, *, num_classes):
    n = x.shape[0]
    n_pad, tile = _choose_tiling(n)
    adj = adj.astype(jnp.bfloat16)
    if n_pad != n:
        x = jnp.pad(x, ((0, n_pad - n), (0, 0)))
        adj = jnp.pad(adj, ((0, n_pad - n), (0, n_pad - n)))

    # GAT1: num_features -> 8, heads=8, concat -> [N, 64], fused ReLU.
    h = gat_conv(x, adj, params["w1"], params["a_src1"], params["a_dst1"], params["b1"],
                 heads=8, f_out=8, tile=tile, apply_relu=True)
    # GAT2: 64 -> num_classes, heads=1, fused log_softmax over classes.
    out = gat_conv(h, adj, params["w2"], params["a_src2"], params["a_dst2"], params["b2"],
                   heads=1, f_out=num_classes, tile=tile, apply_log_softmax=True)
    return out[:n]


# ----------------------------- reference (pure jnp) ---------------------------


def gat_ref(x, adj, params, num_classes):
    adj = adj.astype(jnp.float32)

    def conv(xi, w, a_src, a_dst, b, heads, f_out):
        xp = (xi @ w).reshape(-1, heads, f_out)                  # [N, H, F]
        ss = jnp.einsum("nhf,hf->hn", xp, a_src)                 # [H, N] source scores
        sd = jnp.einsum("nhf,hf->nh", xp, a_dst)                 # [N, H] dst scores
        e = sd.T[:, :, None] + ss[:, None, :]                    # [H, N_dst, N_src]
        e = jnp.where(e > 0, e, 0.2 * e)
        e = jnp.where(adj[None] > 0, e, -1e30)
        e = e - e.max(-1, keepdims=True)
        p = jnp.exp(e)
        alpha = p / p.sum(-1, keepdims=True)
        out = jnp.einsum("hij,jhf->ihf", alpha, xp).reshape(-1, heads * f_out)
        return out + b

    h = jax.nn.relu(conv(x, params["w1"], params["a_src1"], params["a_dst1"],
                         params["b1"], 8, 8))
    o = conv(h, params["w2"], params["a_src2"], params["a_dst2"],
             params["b2"], 1, num_classes)
    return jax.nn.log_softmax(o, axis=1)


# ----------------------------- self test --------------------------------------


if __name__ == "__main__":
    key = jax.random.PRNGKey(0)
    N, F_IN, NUM_CLASSES, E = 32, 16, 4, 96
    H1, F1 = 8, 8

    ks = jax.random.split(key, 10)
    x = jax.random.normal(ks[0], (N, F_IN), jnp.float32)
    src = jax.random.randint(ks[1], (E,), 0, N)
    dst = jax.random.randint(ks[2], (E,), 0, N)
    edge_index = jnp.stack([src, dst])            # [2, E]: row 0 = source, row 1 = target

    # Dense adjacency with self loops (PyG GATConv default add_self_loops=True), bf16 mask.
    adj = jnp.zeros((N, N), jnp.bfloat16)
    adj = adj.at[edge_index[1], edge_index[0]].set(1.0)
    adj = adj.at[jnp.arange(N), jnp.arange(N)].set(1.0)

    def glorot(k, shape):
        s = jnp.sqrt(6.0 / (shape[0] + shape[-1]))
        return jax.random.uniform(k, shape, jnp.float32, -s, s)

    params = {
        "w1": glorot(ks[3], (F_IN, H1 * F1)),          # GATConv1 weight
        "a_src1": glorot(ks[4], (H1, F1)),             # att_src
        "a_dst1": glorot(ks[5], (H1, F1)),             # att_dst
        "b1": jnp.zeros((1, H1 * F1), jnp.float32),    # bias
        "w2": glorot(ks[6], (H1 * F1, NUM_CLASSES)),
        "a_src2": glorot(ks[7], (1, NUM_CLASSES)),
        "a_dst2": glorot(ks[8], (1, NUM_CLASSES)),
        "b2": jnp.zeros((1, NUM_CLASSES), jnp.float32),
    }

    out = gat_forward(x, adj, params, num_classes=NUM_CLASSES)
    out = jax.block_until_ready(out)

    assert out.shape == (N, NUM_CLASSES)
    assert bool(jnp.all(jnp.isfinite(out)))
    # log_softmax rows must normalize.
    assert bool(jnp.allclose(jnp.sum(jnp.exp(out), axis=1), 1.0, atol=1e-3))
    # Loose comparison vs pure-jnp f32 reference (kernel uses bf16 matmuls).
    ref = gat_ref(x, adj, params, NUM_CLASSES)
    assert bool(jnp.allclose(out, ref, atol=0.25, rtol=0.05))
    print("KERNEL_OK")
</pallas_src>

<mosaic_0001>
module attributes {stable_mosaic.version = 11 : i64} {
  func.func @project_kernel(%arg0: i32, %arg1: memref<32x16xf32, #tpu.memory_space<vmem>>, %arg2: memref<16x64xf32, #tpu.memory_space<vmem>>, %arg3: memref<8x64xf32, #tpu.memory_space<vmem>>, %arg4: memref<64x8xf32, #tpu.memory_space<vmem>>, %arg5: memref<32x64xbf16, #tpu.memory_space<vmem>>, %arg6: memref<8x32xf32, #tpu.memory_space<vmem>>, %arg7: memref<32x8xf32, #tpu.memory_space<vmem>>) attributes {dimension_semantics = [#tpu.dimension_semantics<parallel>], iteration_bounds = array<i64: 1>, scalar_prefetch = 0 : i64, scratch_operands = 0 : i64, tpu.core_type = #tpu.core_type<tc>, window_params = [{transform_indices = @transform_0, window_bounds = array<i64: 32, 16>}, {pipeline_mode = #tpu.pipeline_mode<synchronous>, transform_indices = @transform_1, window_bounds = array<i64: 16, 64>}, {pipeline_mode = #tpu.pipeline_mode<synchronous>, transform_indices = @transform_2, window_bounds = array<i64: 8, 64>}, {pipeline_mode = #tpu.pipeline_mode<synchronous>, transform_indices = @transform_3, window_bounds = array<i64: 64, 8>}, {transform_indices = @transform_4, window_bounds = array<i64: 32, 64>}, {transform_indices = @transform_5, window_bounds = array<i64: 8, 32>}, {transform_indices = @transform_6, window_bounds = array<i64: 32, 8>}]} {
    %c0 = arith.constant 0 : index
    %c0_0 = arith.constant 0 : index
    %0 = vector.load %arg1[%c0, %c0_0] : memref<32x16xf32, #tpu.memory_space<vmem>>, vector<32x16xf32>
    %1 = arith.truncf %0 : vector<32x16xf32> to vector<32x16xbf16>
    %c0_1 = arith.constant 0 : index
    %c0_2 = arith.constant 0 : index
    %2 = vector.load %arg2[%c0_1, %c0_2] : memref<16x64xf32, #tpu.memory_space<vmem>>, vector<16x64xf32>
    %3 = arith.truncf %2 : vector<16x64xf32> to vector<16x64xbf16>
    %cst = arith.constant dense<0.000000e+00> : vector<32x64xf32>
    %4 = tpu.matmul %1, %3, %cst {dimension_numbers = #tpu.dot_dimension_numbers<[1], [0], [0], [1], [0, 0, 1, 1], [], []>} : vector<32x16xbf16>, vector<16x64xbf16>, vector<32x64xf32> -> vector<32x64xf32>
    %c0_3 = arith.constant 0 : index
    %c0_4 = arith.constant 0 : index
    %5 = vector.load %arg3[%c0_3, %c0_4] : memref<8x64xf32, #tpu.memory_space<vmem>>, vector<8x64xf32>
    %cst_5 = arith.constant dense<0.000000e+00> : vector<8x32xf32>
    %6 = tpu.matmul %5, %4, %cst_5 {dimension_numbers = #tpu.dot_dimension_numbers<[1], [1], [0], [0], [0, 0, 1, 0], [], []>} : vector<8x64xf32>, vector<32x64xf32>, vector<8x32xf32> -> vector<8x32xf32>
    %c0_6 = arith.constant 0 : index
    %c0_7 = arith.constant 0 : index
    %7 = vector.load %arg6[%c0_6, %c0_7] : memref<8x32xf32, #tpu.memory_space<vmem>>, vector<8x32xf32>
    tpu.vector_store %arg6[%c0_6, %c0_7], %6 {strides = array<i32>} : memref<8x32xf32, #tpu.memory_space<vmem>>, vector<8x32xf32>,
    %c0_8 = arith.constant 0 : index
    %c0_9 = arith.constant 0 : index
    %8 = vector.load %arg4[%c0_8, %c0_9] : memref<64x8xf32, #tpu.memory_space<vmem>>, vector<64x8xf32>
    %cst_10 = arith.constant dense<0.000000e+00> : vector<32x8xf32>
    %9 = tpu.matmul %4, %8, %cst_10 {dimension_numbers = #tpu.dot_dimension_numbers<[1], [0], [0], [1], [0, 0, 1, 1], [], []>} : vector<32x64xf32>, vector<64x8xf32>, vector<32x8xf32> -> vector<32x8xf32>
    %c0_11 = arith.constant 0 : index
    %c0_12 = arith.constant 0 : index
    %10 = vector.load %arg7[%c0_11, %c0_12] : memref<32x8xf32, #tpu.memory_space<vmem>>, vector<32x8xf32>
    tpu.vector_store %arg7[%c0_11, %c0_12], %9 {strides = array<i32>} : memref<32x8xf32, #tpu.memory_space<vmem>>, vector<32x8xf32>,
    %11 = arith.truncf %4 : vector<32x64xf32> to vector<32x64xbf16>
    %c0_13 = arith.constant 0 : index
    %c0_14 = arith.constant 0 : index
    %12 = vector.load %arg5[%c0_13, %c0_14] : memref<32x64xbf16, #tpu.memory_space<vmem>>, vector<32x64xbf16>
    tpu.vector_store %arg5[%c0_13, %c0_14], %11 {strides = array<i32>} : memref<32x64xbf16, #tpu.memory_space<vmem>>, vector<32x64xbf16>,
    return
  }
  func.func @transform_0(%arg0: i32) -> (i32, i32) {
    %c0_i32 = arith.constant 0 : i32
    %c0_i32_0 = arith.constant 0 : i32
    return %arg0, %c0_i32 : i32, i32
  }
  func.func @transform_1(%arg0: i32) -> (i32, i32) {
    %c0_i32 = arith.constant 0 : i32
    %c0_i32_0 = arith.constant 0 : i32
    %c0_i32_1 = arith.constant 0 : i32
    return %c0_i32, %c0_i32_0 : i32, i32
  }
  func.func @transform_2(%arg0: i32) -> (i32, i32) {
    %c0_i32 = arith.constant 0 : i32
    %c0_i32_0 = arith.constant 0 : i32
    %c0_i32_1 = arith.constant 0 : i32
    return %c0_i32, %c0_i32_0 : i32, i32
  }
  func.func @transform_3(%arg0: i32) -> (i32, i32) {
    %c0_i32 = arith.constant 0 : i32
    %c0_i32_0 = arith.constant 0 : i32
    %c0_i32_1 = arith.constant 0 : i32
    return %c0_i32, %c0_i32_0 : i32, i32
  }
  func.func @transform_4(%arg0: i32) -> (i32, i32) {
    %c0_i32 = arith.constant 0 : i32
    %c0_i32_0 = arith.constant 0 : i32
    return %arg0, %c0_i32 : i32, i32
  }
  func.func @transform_5(%arg0: i32) -> (i32, i32) {
    %c0_i32 = arith.constant 0 : i32
    %c0_i32_0 = arith.constant 0 : i32
    return %c0_i32, %arg0 : i32, i32
  }
  func.func @transform_6(%arg0: i32) -> (i32, i32) {
    %c0_i32 = arith.constant 0 : i32
    %c0_i32_0 = arith.constant 0 : i32
    return %arg0, %c0_i32 : i32, i32
  }
}

</mosaic_0001>

<bundles_post_ra>
// kernel: tpu_custom_call.1
= control target key start
LH: loop header
LB: loop body
LE: loop exit
PB: predicated region body
PF: predicated region fallthrough
CT: control target
= control target key end

     0   :  { %12 = vsyncpa [#allocation3], 0  ;;  %vm32_vm0 = vcmask 130048   ;;  %s623_s0 = inlined_call_operand.vmem [shape: f32[32,16], index: 0, kind: input, shape index: {}]   ;;  %s624_s1 = inlined_call_operand.vmem [shape: f32[16,64], index: 1, kind: input, shape index: {}]   ;;  %s625_s2 = inlined_call_operand.vmem [shape: f32[8,64], index: 2, kind: input, shape index: {}]   ;;  %s626_s3 = inlined_call_operand.vmem [shape: f32[64,8], index: 3, kind: input, shape index: {}]   ;;  %s627_s4 = inlined_call_operand.hbm [shape: bf16[32,64], index: 4, kind: output, shape index: {0}]   ;;  %s628_s5 = inlined_call_operand.hbm [shape: f32[8,32], index: 5, kind: output, shape index: {1}]   ;;  %s629_s6 = inlined_call_operand.vmem [shape: f32[32,8], index: 6, kind: output, shape index: {2}]  }
   0x1   :  { %v29_v0 = vld [vmem:[%s624_s1] sm:$0xff]  ;;  %v30_v1 = vld [vmem:[%s624_s1 + $0x8] sm:$0xff]  ;;  %v25_v5 = vld [vmem:[%s623_s0 + $0x10] sm:$0xff] }
   0x2   :  { %v23_v2 = vld [vmem:[%s623_s0] sm:$0xff]  ;;  %v31_v3 = vpack.c.bf16 %v30_v1, %v29_v0  ;;  %v24_v4 = vld [vmem:[%s623_s0 + $0x8] sm:$0xff]  ;;  %v26_v6 = vld [vmem:[%s623_s0 + $0x18] sm:$0xff] }
   0x3   :  { %v27_v7 = vpack.c.bf16 %v24_v4, %v23_v2  ;;  %v177_v8 = vld [vmem:[%s626_s3] sm:$0xff]  ;;  %v178_v9 = vld [vmem:[%s626_s3 + $0x8] sm:$0xff]  ;;  %v179_v10 = vld [vmem:[%s626_s3 + $0x10] sm:$0xff]  ;;  %v28_v11 = vpack.c.bf16 %v26_v6, %v25_v5 }
   0x4   :  { %369 = vmatprep.subr.bf16.mxu1 %v31_v3  ;;  %v416_v12 = vpack.c.bf16 %v178_v9, %v177_v8  ;;  %v180_v13 = vld [vmem:[%s626_s3 + $0x18] sm:$0xff]  ;;  %v181_v15 = vld [vmem:[%s626_s3 + $0x20] sm:$0xff]  ;;  %v182_v16 = vld [vmem:[%s626_s3 + $0x28] sm:$0xff] }
   0x5   :  { %370 = vmatpush3.bf16.msra.mxu1 %v31_v3  ;;  %371 = vmatprep.mubr.msk.bf16.mxu1 %vm32_vm0, %v27_v7  ;;  %v420_v14 = vpack.c.bf16 %v180_v13, %v179_v10 }
   0x6   :  { %13 = vsyncpa [#allocation5], 0  ;;  %417 = vmatprep.subr.bf16.mxu0 %v416_v12  ;;  %v424_v17 = vpack.c.bf16 %v182_v16, %v181_v15  ;;  %v183_v18 = vld [vmem:[%s626_s3 + $0x30] sm:$0xff]  ;;  %v184_v19 = vld [vmem:[%s626_s3 + $0x38] sm:$0xff]  ;;  %v487_v21 = vmov 0.0|0.0   ;;  %vm488_vm1 = vmmov 0  }
   0x7   :  { %419 = vmatpush3.bf16.msra.mxu0 %v416_v12  ;;  %v428_v20 = vpack.c.bf16 %v184_v19, %v183_v18  ;;  %408 = vmatprep.subr.bf16.mxu1 %v487_v21  ;;  %v489_v22 = vmov 0.0   ;;  %vm89_vm2 = vcmask 523264   ;;  %vm291_vm3 = vcmask 519168   ;;  %v88_v33 = vld [vmem:[%s625_s2] sm:$0xff]  ;;  %s490_s24 = smov [#allocation2]  }
   0x8   :  { %372 = vmatmul.mubr.msk.bf16.vlgmr.msra.gmra.mrb[0].mxu1 %vm32_vm0, %v28_v11  ;;  %421 = vmatprep.subr.bf16.mxu0 %v420_v14  ;;  %vm410_vm4 = vmpackc.low %vm89_vm2, %vm89_vm2  ;;  %s301_s25 = sshll.u32 %s490_s24, 4  ;;  %s302_s25 = int_to_ptr.vmem [resolvable:$true] %s301_s25 }
   0x9   :  { %383 = vmatprep.mubr.msk.f32.mxu1 %vm488_vm1, %v489_v22  ;;  %s439_s26 = scalar_lea.vmem %s302_s25, 256  ;;  %p444_p1 = scmp.lt.s32.totalorder %s302_s25, %s302_s25 }
   0xa   :  { %p440_p0 = scmp.ne.s32.totalorder %s302_s25, %s439_s26  ;;  %p445_p2 = scmp.lt.s32.totalorder %s439_s26, %s439_s26 }
   0xb   :  { %423 = vmatpush3.bf16.msra.mxu0 %v420_v14 }
   0xc   :  { %425 = vmatprep.subr.bf16.mxu0 %v424_v17  ;;  %p446_p3 = por %p445_p2, %p444_p1 }
   0xe   :  { %p447_p4 = pnand %p446_p3, %p440_p0 }
   0xf   :  { %427 = vmatpush3.bf16.msra.mxu0 %v424_v17 }
  0x10   :  { %429 = vmatprep.subr.bf16.mxu0 %v428_v20 }
  0x13   :  { %431 = vmatpush3.bf16.msra.mxu0 %v428_v20 }
  0xdb   :  { %v373_v23 = vpop.f32.mrb[0].mxu1 }
  0xdc   :  { %v347_v24 = vpack.c.bf16 %v373_v23, %v373_v23  ;;  %v73_v25 = vpop.f32.mrb[1].mxu1 }
  0xdd   :  { %v345_v26 = vpack.c.bf16 %v73_v25, %v73_v25  ;;  %v374_v27 = vpop.f32.mrb[2].mxu1  ;;  %402 = vmatprep.mubr.msk.f32.mxu0 %vm89_vm2, %v73_v25 }
  0xde   :  { %294 = vst.msk [vmem:[#allocation2 + $0x8] sm:$0xf] %vm291_vm3, %v347_v24  ;;  %v413_v28 = vpack.c.bf16 %v374_v27, %v373_v23  ;;  %v348_v29 = vpack.c.bf16 %v374_v27, %v374_v27  ;;  %v76_v30 = vpop.f32.mrb[3].mxu1 }
  0xdf   :  { %292 = vst.msk [vmem:[#allocation2] sm:$0xf] %vm291_vm3, %v345_v26  ;;  %v409_v31 = vpack.c.bf16 %v76_v30, %v73_v25  ;;  %v346_v32 = vpack.c.bf16 %v76_v30, %v76_v30  ;;  %403 = vmatmul.mubr.msk.f32.vlgmr.msra.gmra.mrb[0].mxu0 %vm89_vm2, %v76_v30 }
  0xe0   :  { %295 = vst.msk [vmem:[#allocation2 + $0xc] sm:$0xf] %vm291_vm3, %v348_v29  ;;  %405 = vmatprep.mubr.msk.f32.mxu0 %vm89_vm2, %v373_v23 }
  0xe1   :  { %293 = vst.msk [vmem:[#allocation2 + $0x4] sm:$0xf] %vm291_vm3, %v346_v32  ;;  %411 = vmatpush3.bf16.xpose.msk.msra.mxu1 %vm410_vm4, %v409_v31 }
  0xe2   :  { %412 = vmatprep.subr.bf16.mxu1 %v487_v21 }
  0xe3   :  { %406 = vmatmul.mubr.msk.f32.gmra.mrb[2].mxu0 %vm89_vm2, %v374_v27 }
  0xe9   :  { %415 = vmatpush3.bf16.xpose.msk.msra.mxu1 %vm410_vm4, %v413_v28 }
  0xf0   :  { %384 = vmatmul.mubr.msk.f32.vlgmr.msra.gmra.mrb[4].mxu1 %vm89_vm2, %v88_v33 }
  0xf1   :  { %450 = shalt.err (!%p447_p4)
}
  0xf2   :  { %s451_s29 = scalar_lea.hbm %s627_s4, 256 }
  0xf3   :  { %p452_p5 = scmp.ne.s32.totalorder %s627_s4, %s451_s29  ;;  %p455_p6 = scmp.lt.u32.totalorder %s451_s29, %s627_s4 }
  0xf5   :  { %p457_p7 = pnand %p455_p6, %p452_p5 }
  0xf7   :  { %460 = shalt.err (!%p457_p7)
}
  0xf8   :  { %s491_s1 = smov 64   ;;  %s492_s9 = smov 4   ;;  %vm270_vm5 = vcmask 64512   ;;  %vm175_vm6 = vcmask 261120  }
  0xf9   :  { %307 = dma.vmem_to_hbm [thread:$0]  %s302_s25, 256, %s627_s4, [#allocation3], %s491_s1, %s491_s1, %s492_s9  }
  0xfa   :  { %s493_s4 = smov [#allocation4]  }
  0xfb   :  { %s314_s19 = sshll.u32 %s493_s4, 4  ;;  %s315_s19 = int_to_ptr.vmem [resolvable:$true] %s314_s19 }
  0xfc   :  { %s461_s20 = scalar_lea.vmem %s315_s19, 128  ;;  %p466_p9 = scmp.lt.s32.totalorder %s315_s19, %s315_s19 }
  0xfd   :  { %p462_p8 = scmp.ne.s32.totalorder %s315_s19, %s461_s20  ;;  %p467_p10 = scmp.lt.s32.totalorder %s461_s20, %s461_s20 }
  0xff   :  { %p468_p11 = por %p467_p10, %p466_p9 }
 0x101   :  { %p469_p12 = pnand %p468_p11, %p462_p8 }
 0x1b2   :  { %v404_v34 = vpop.f32.mrb[0].mxu0 }
 0x1b3   :  { %272 = vst.msk [vmem:[%s629_s6 + $0x8] sm:$0xff] %vm270_vm5, %v404_v34  ;;  %v251_v35 = vpop.f32.mrb[1].mxu0 }
 0x1b4   :  { %271 = vst.msk [vmem:[%s629_s6] sm:$0xff] %vm270_vm5, %v251_v35 }
 0x1b6   :  { %v407_v36 = vpop.f32.mrb[2].mxu0 }
 0x1b7   :  { %274 = vst.msk [vmem:[%s629_s6 + $0x18] sm:$0xff] %vm270_vm5, %v407_v36  ;;  %v261_v37 = vpop.f32.mrb[3].mxu0 }
 0x1b8   :  { %273 = vst.msk [vmem:[%s629_s6 + $0x10] sm:$0xff] %vm270_vm5, %v261_v37 }
 0x1c3   :  { %v171_v38 = vpop.f32.mrb[4].mxu1 }
 0x1c4   :  { %176 = vst.msk [vmem:[#allocation4] sm:$0xff] %vm175_vm6, %v171_v38  ;;  %v385_v39 = vpop.f32.mrb[5].mxu1 }
 0x1c5   :  { %472 = shalt.err (!%p469_p12)
}
 0x1c6   :  { %s473_s3 = scalar_lea.hbm %s628_s5, 128 }
 0x1c7   :  { %p474_p13 = scmp.ne.s32.totalorder %s628_s5, %s473_s3  ;;  %p477_p0 = scmp.lt.u32.totalorder %s473_s3, %s628_s5 }
 0x1c9   :  { %p479_p1 = pnand %p477_p0, %p474_p13 }
 0x1cb   :  { %482 = shalt.err (!%p479_p1)
}
 0x1cc   :  { %317 = dma.vmem_to_hbm [thread:$0]  %s315_s19, 128, %s628_s5, [#allocation5]  }
 0x1cd   :  { %483 = dma.done.wait [#allocation3], 256  }
 0x1ce   :  { %484 = vsyncadd [#allocation3], 4294967040 }
 0x1cf   :  { %485 = dma.done.wait [#allocation5], 128  }
 0x1d0   :  { %486 = vsyncadd [#allocation5], 4294967168 }
 0x1d1   :  { %328 = vsyncpa [#allocation3], 1 }
 0x1d2   :  { %329 = vsyncpa [#allocation5], 1 }

</bundles_post_ra>
